<compile_context>
chip_gen: v5e
topology: v5e:2x2
jax: 0.10.0
libtpu: 0.0.40
codegen_flags: <defaults>
</compile_context>

<pallas_src>
import jax
import jax.numpy as jnp
from jax.experimental import pallas as pl
from jax.experimental.pallas import tpu as pltpu


def _round_up(x: int, m: int) -> int:
    return ((x + m - 1) // m) * m


def _vmem_capacity_bytes() -> int:
    try:
        info = pltpu.get_tpu_info()
        cap = getattr(info, "vmem_capacity_bytes", None)
        if cap:
            return int(cap)
    except Exception:
        pass
    return 64 * 1024 * 1024  # conservative default (v7x)


def _pad_cast(a, shape, dtype):
    """Cast to `dtype` and zero-pad to `shape` (no-op when already matching)."""
    a = a.astype(dtype)
    if a.shape == tuple(shape):
        return a
    out = jnp.zeros(shape, dtype)
    return out.at[: a.shape[0], : a.shape[1]].set(a)


# ----------------------------------------------------------------------------
# Kernels
# ----------------------------------------------------------------------------
def _make_diff_kernel(tk: int, x_resident: bool):
    """Grid = (row_tiles, k_tiles). relu((D @ X) @ W^T), W^T applied in epilogue.

    d_ref:  (tm, tk) bf16 tile of the padded diffusion matrix
    x_ref:  (n_p, in_fp) bf16 (resident) or (tk, in_fp) bf16 (streamed k-slab)
    wt_ref: (in_fp, out_fp) f32, resident pre-transposed weight
    o_ref:  (tm, out_fp) output row tile (resident across the k axis)
    acc_ref:(tm, in_fp) f32 accumulator for D @ X
    """

    def kernel(d_ref, x_ref, wt_ref, o_ref, acc_ref):
        k = pl.program_id(1)

        @pl.when(k == 0)
        def _():
            acc_ref[...] = jnp.zeros_like(acc_ref)

        if x_resident:
            x_slab = x_ref[pl.ds(pl.multiple_of(k * tk, tk), tk), :]
        else:
            x_slab = x_ref[...]

        # bf16 x bf16 -> f32 accumulation of this k-slab of D @ X.
        acc_ref[...] += jnp.dot(d_ref[...], x_slab,
                                preferred_element_type=jnp.float32)

        @pl.when(k == pl.num_programs(1) - 1)
        def _():
            # Epilogue: fold through W^T once per row tile, then ReLU.
            # Padded rows/lanes stay zero (0 @ W = 0, relu(0) = 0).
            y = jnp.dot(acc_ref[...], wt_ref[...],
                        preferred_element_type=jnp.float32)
            o_ref[...] = jnp.maximum(y, 0.0).astype(o_ref.dtype)

    return kernel


def _nodiff_kernel(x_ref, wt_ref, o_ref):
    """Grid = (row_tiles,). relu(X @ W^T) for one row tile (pure f32)."""
    y = jnp.dot(x_ref[...], wt_ref[...], preferred_element_type=jnp.float32)
    o_ref[...] = jnp.maximum(y, 0.0).astype(o_ref.dtype)


# ----------------------------------------------------------------------------
# Wrapper
# ----------------------------------------------------------------------------
def hidden_dense_layer_forward(x, weight, diffusion=None):
    """Pallas implementation of hidden_dense_layer.forward (eval mode, ReLU, no BN).

    x:         [N, in_features]
    weight:    [out_features, in_features]   (PyTorch nn.Linear layout)
    diffusion: [N, N] or None
    returns:   [N, out_features]
    """
    n, in_f = x.shape
    out_f = weight.shape[0]
    out_dtype = x.dtype
    out_isz = jnp.dtype(out_dtype).itemsize

    in_fp = _round_up(in_f, 128)
    out_fp = _round_up(out_f, 128)

    # Pre-transposed, padded weight; stays f32 for the (small) epilogue matmul.
    wt_p = _pad_cast(weight.T, (in_fp, out_fp), jnp.float32)

    vmem_cap = _vmem_capacity_bytes()
    limit_cap = min(int(vmem_cap * 0.85), 100 * 1024 * 1024)

    # ------------------------------------------------------------------ no-D
    if diffusion is None:
        tm = min(512, _round_up(n, 128))
        n_p = _round_up(n, tm)
        x_p = _pad_cast(x, (n_p, in_fp), out_dtype)

        footprint = ((2 * tm * in_fp + 2 * in_fp * out_fp) * 4
                     + 2 * tm * out_fp * out_isz)
        vmem_limit = min(max(2 * footprint, 32 * 1024 * 1024), limit_cap)
        cost = pl.CostEstimate(
            flops=2 * n_p * in_fp * out_fp,
            transcendentals=0,
            bytes_accessed=(n_p * in_fp * out_isz + in_fp * out_fp * 4
                            + n_p * out_fp * out_isz),
        )

        out_p = pl.pallas_call(
            _nodiff_kernel,
            out_shape=jax.ShapeDtypeStruct((n_p, out_fp), out_dtype),
            grid_spec=pltpu.PrefetchScalarGridSpec(
                num_scalar_prefetch=0,
                grid=(n_p // tm,),
                in_specs=[
                    pl.BlockSpec((tm, in_fp), lambda i: (i, 0)),        # X row tile
                    pl.BlockSpec((in_fp, out_fp), lambda i: (0, 0)),    # W^T resident
                ],
                out_specs=pl.BlockSpec((tm, out_fp), lambda i: (i, 0)),
            ),
            compiler_params=pltpu.CompilerParams(
                dimension_semantics=("parallel",),
                vmem_limit_bytes=vmem_limit,
            ),
            cost_estimate=cost,
        )(x_p, wt_p)
        return out_p[:n, :out_f]

    # ------------------------------------------------------------ diffusion
    # Tile selection: up to 512 for large graphs; keep >= 2 row tiles where
    # possible so the "parallel" row axis can shard across 2 TCs (v7x).
    if n >= 512:
        t = 512
    elif n >= 256:
        t = 256
    else:
        t = 128
    tm = tk = t
    n_p = _round_up(n, t)
    if n_p // tm < 2 and n_p >= 256:
        tm = n_p // 2  # still a multiple of 128 (n_p is a multiple of 256 here)

    comp_dtype = jnp.bfloat16  # D / X streamed as bf16, accumulation in f32
    x_bytes = n_p * in_fp * 2

    def _footprint(x_each):
        return (2 * tm * tk * 2              # D tile, double-buffered, bf16
                + 2 * x_each                 # X (resident or slab), 2 buffers
                + 2 * in_fp * out_fp * 4     # resident W^T (f32), 2 buffers
                + 2 * tm * out_fp * out_isz  # output tile, 2 buffers
                + tm * in_fp * 4)            # f32 accumulator scratch

    # Shrink tiles if even the streamed-X working set would overflow the budget.
    while _footprint(tk * in_fp * 2) > limit_cap and (tm > 128 or tk > 128):
        if tk > 128:
            tk //= 2
        else:
            tm //= 2

    x_resident = (x_bytes <= 12 * 1024 * 1024
                  and _footprint(x_bytes) <= limit_cap)
    footprint = _footprint(x_bytes if x_resident else tk * in_fp * 2)
    vmem_limit = min(max(2 * footprint, 32 * 1024 * 1024), limit_cap)

    # Padding is fused into the (needed anyway) bf16 cast; no-op if aligned.
    d_p = _pad_cast(diffusion, (n_p, n_p), comp_dtype)
    x_p = _pad_cast(x, (n_p, in_fp), comp_dtype)

    n_row_tiles = n_p // tm
    x_read_bytes = x_bytes if x_resident else n_row_tiles * n_p * in_fp * 2
    cost = pl.CostEstimate(
        flops=2 * n_p * n_p * in_fp + 2 * n_p * in_fp * out_fp,
        transcendentals=0,
        bytes_accessed=(n_p * n_p * 2 + x_read_bytes + in_fp * out_fp * 4
                        + n_p * out_fp * out_isz),
    )

    if x_resident:
        x_spec = pl.BlockSpec((n_p, in_fp), lambda i, k: (0, 0))     # resident
    else:
        x_spec = pl.BlockSpec((tk, in_fp), lambda i, k: (k, 0))      # k-slab

    kernel = _make_diff_kernel(tk, x_resident)

    out_p = pl.pallas_call(
        kernel,
        out_shape=jax.ShapeDtypeStruct((n_p, out_fp), out_dtype),
        grid_spec=pltpu.PrefetchScalarGridSpec(
            num_scalar_prefetch=0,
            grid=(n_p // tm, n_p // tk),
            in_specs=[
                pl.BlockSpec((tm, tk), lambda i, k: (i, k)),          # D tile (bf16)
                x_spec,                                               # X (bf16)
                pl.BlockSpec((in_fp, out_fp), lambda i, k: (0, 0)),   # W^T resident
            ],
            out_specs=pl.BlockSpec((tm, out_fp), lambda i, k: (i, 0)),
            scratch_shapes=[pltpu.VMEM((tm, in_fp), jnp.float32)],
        ),
        compiler_params=pltpu.CompilerParams(
            dimension_semantics=("parallel", "arbitrary"),
            vmem_limit_bytes=vmem_limit,
        ),
        cost_estimate=cost,
    )(d_p, x_p, wt_p)

    # Slice padded rows / lanes back off.
    return out_p[:n, :out_f]


# ----------------------------------------------------------------------------
# Self-test
# ----------------------------------------------------------------------------
if __name__ == "__main__":
    key = jax.random.PRNGKey(0)

    def make_case(key, n, in_f, out_f):
        k_x, k_w, k_d = jax.random.split(key, 3)
        x = jax.random.normal(k_x, (n, in_f), dtype=jnp.float32)
        # PyTorch nn.Linear default init: U(-1/sqrt(in_features), 1/sqrt(in_features))
        bound = 1.0 / (in_f ** 0.5)
        w = jax.random.uniform(k_w, (out_f, in_f), minval=-bound, maxval=bound,
                               dtype=jnp.float32)
        # Symmetric, row-normalized "adjacency-like" diffusion matrix.
        a = jax.random.uniform(k_d, (n, n), dtype=jnp.float32)
        a = 0.5 * (a + a.T) + jnp.eye(n, dtype=jnp.float32)
        d = a / jnp.sum(a, axis=1, keepdims=True)
        return x, w, d

    k1, k2 = jax.random.split(key)

    # Case 1: small shapes consistent with the module (N=16, in=32, out=16).
    x1, w1, d1 = make_case(k1, 16, 32, 16)
    out1 = jax.block_until_ready(hidden_dense_layer_forward(x1, w1, diffusion=d1))
    ref1 = jnp.maximum((d1 @ x1) @ w1.T, 0.0)
    assert out1.shape == (16, 16)
    assert jnp.allclose(out1, ref1, atol=1e-2, rtol=1e-2), \
        float(jnp.max(jnp.abs(out1 - ref1)))

    # Case 1b: no-diffusion path (pure f32, tight tolerance).
    out1b = jax.block_until_ready(hidden_dense_layer_forward(x1, w1, diffusion=None))
    ref1b = jnp.maximum(x1 @ w1.T, 0.0)
    assert jnp.allclose(out1b, ref1b, atol=1e-5, rtol=1e-5)

    # Case 2: multi-tile grid + padding + resident-X + bf16 streaming
    # (N=320 -> 512 padded, in=200 -> 256, out=70 -> 128).
    x2, w2, d2 = make_case(k2, 320, 200, 70)
    out2 = jax.block_until_ready(hidden_dense_layer_forward(x2, w2, diffusion=d2))
    ref2 = jnp.maximum((d2 @ x2) @ w2.T, 0.0)
    assert out2.shape == (320, 70)
    assert jnp.allclose(out2, ref2, atol=1e-2, rtol=1e-2), \
        float(jnp.max(jnp.abs(out2 - ref2)))

    print("KERNEL_OK")
</pallas_src>

<mosaic_0001>
module attributes {stable_mosaic.version = 11 : i64} {
  func.func @kernel(%arg0: i32, %arg1: i32, %arg2: memref<128x128xbf16, #tpu.memory_space<vmem>>, %arg3: memref<128x128xbf16, #tpu.memory_space<vmem>>, %arg4: memref<128x128xf32, #tpu.memory_space<vmem>>, %arg5: memref<128x128xf32, #tpu.memory_space<vmem>>, %arg6: memref<128x128xf32, #tpu.memory_space<vmem>>) attributes {dimension_semantics = [#tpu.dimension_semantics<parallel>, #tpu.dimension_semantics<arbitrary>], iteration_bounds = array<i64: 1, 1>, scalar_prefetch = 0 : i64, scratch_operands = 1 : i64, tpu.core_type = #tpu.core_type<tc>, window_params = [{transform_indices = @transform_0, window_bounds = array<i64: 128, 128>}, {pipeline_mode = #tpu.pipeline_mode<synchronous>, transform_indices = @transform_1, window_bounds = array<i64: 128, 128>}, {pipeline_mode = #tpu.pipeline_mode<synchronous>, transform_indices = @transform_2, window_bounds = array<i64: 128, 128>}, {transform_indices = @transform_3, window_bounds = array<i64: 128, 128>}]} {
    %c0_i32 = arith.constant 0 : i32
    %0 = arith.cmpi eq, %arg1, %c0_i32 : i32
    %1 = arith.extui %0 : i1 to i32
    %c0_i32_0 = arith.constant 0 : i32
    %2 = arith.cmpi ne, %1, %c0_i32_0 : i32
    scf.if %2 {
      %cst_9 = arith.constant 0.000000e+00 : f32
      %15 = vector.broadcast %cst_9 : f32 to vector<128x128xf32>
      %c0_10 = arith.constant 0 : index
      %c0_11 = arith.constant 0 : index
      %16 = vector.load %arg6[%c0_10, %c0_11] : memref<128x128xf32, #tpu.memory_space<vmem>>, vector<128x128xf32>
      tpu.vector_store %arg6[%c0_10, %c0_11], %15 {strides = array<i32>} : memref<128x128xf32, #tpu.memory_space<vmem>>, vector<128x128xf32>,
    } else {
    }
    %c128_i32 = arith.constant 128 : i32
    %3 = arith.muli %arg1, %c128_i32 : i32
    %4 = tpu.assume_multiple %3, 128 : i32
    %5 = arith.index_cast %4 : i32 to index
    %c0 = arith.constant 0 : index
    %6 = vector.load %arg3[%5, %c0] : memref<128x128xbf16, #tpu.memory_space<vmem>>, vector<128x128xbf16>
    %c0_1 = arith.constant 0 : index
    %c0_2 = arith.constant 0 : index
    %7 = vector.load %arg6[%c0_1, %c0_2] : memref<128x128xf32, #tpu.memory_space<vmem>>, vector<128x128xf32>
    %c0_3 = arith.constant 0 : index
    %c0_4 = arith.constant 0 : index
    %8 = vector.load %arg2[%c0_3, %c0_4] : memref<128x128xbf16, #tpu.memory_space<vmem>>, vector<128x128xbf16>
    %cst = arith.constant dense<0.000000e+00> : vector<128x128xf32>
    %9 = tpu.matmul %8, %6, %cst {dimension_numbers = #tpu.dot_dimension_numbers<[1], [0], [0], [1], [0, 0, 1, 1], [], []>} : vector<128x128xbf16>, vector<128x128xbf16>, vector<128x128xf32> -> vector<128x128xf32>
    %10 = arith.addf %7, %9 : vector<128x128xf32>
    %c0_5 = arith.constant 0 : index
    %c0_6 = arith.constant 0 : index
    %11 = vector.load %arg6[%c0_5, %c0_6] : memref<128x128xf32, #tpu.memory_space<vmem>>, vector<128x128xf32>
    tpu.vector_store %arg6[%c0_5, %c0_6], %10 {strides = array<i32>} : memref<128x128xf32, #tpu.memory_space<vmem>>, vector<128x128xf32>,
    %c0_i32_7 = arith.constant 0 : i32
    %12 = arith.cmpi eq, %arg1, %c0_i32_7 : i32
    %13 = arith.extui %12 : i1 to i32
    %c0_i32_8 = arith.constant 0 : i32
    %14 = arith.cmpi ne, %13, %c0_i32_8 : i32
    scf.if %14 {
      %c0_9 = arith.constant 0 : index
      %c0_10 = arith.constant 0 : index
      %15 = vector.load %arg6[%c0_9, %c0_10] : memref<128x128xf32, #tpu.memory_space<vmem>>, vector<128x128xf32>
      %c0_11 = arith.constant 0 : index
      %c0_12 = arith.constant 0 : index
      %16 = vector.load %arg4[%c0_11, %c0_12] : memref<128x128xf32, #tpu.memory_space<vmem>>, vector<128x128xf32>
      %cst_13 = arith.constant dense<0.000000e+00> : vector<128x128xf32>
      %17 = tpu.matmul %15, %16, %cst_13 {dimension_numbers = #tpu.dot_dimension_numbers<[1], [0], [0], [1], [0, 0, 1, 1], [], []>} : vector<128x128xf32>, vector<128x128xf32>, vector<128x128xf32> -> vector<128x128xf32>
      %cst_14 = arith.constant 0.000000e+00 : f32
      %18 = vector.broadcast %cst_14 : f32 to vector<128x128xf32>
      %19 = arith.maximumf %17, %18 : vector<128x128xf32>
      %c0_15 = arith.constant 0 : index
      %c0_16 = arith.constant 0 : index
      %20 = vector.load %arg5[%c0_15, %c0_16] : memref<128x128xf32, #tpu.memory_space<vmem>>, vector<128x128xf32>
      tpu.vector_store %arg5[%c0_15, %c0_16], %19 {strides = array<i32>} : memref<128x128xf32, #tpu.memory_space<vmem>>, vector<128x128xf32>,
    } else {
    }
    return
  }
  func.func @transform_0(%arg0: i32, %arg1: i32) -> (i32, i32) {
    %c0_i32 = arith.constant 0 : i32
    return %arg0, %arg1 : i32, i32
  }
  func.func @transform_1(%arg0: i32, %arg1: i32) -> (i32, i32) {
    %c0_i32 = arith.constant 0 : i32
    %c0_i32_0 = arith.constant 0 : i32
    %c0_i32_1 = arith.constant 0 : i32
    return %c0_i32, %c0_i32_0 : i32, i32
  }
  func.func @transform_2(%arg0: i32, %arg1: i32) -> (i32, i32) {
    %c0_i32 = arith.constant 0 : i32
    %c0_i32_0 = arith.constant 0 : i32
    %c0_i32_1 = arith.constant 0 : i32
    return %c0_i32, %c0_i32_0 : i32, i32
  }
  func.func @transform_3(%arg0: i32, %arg1: i32) -> (i32, i32) {
    %c0_i32 = arith.constant 0 : i32
    %c0_i32_0 = arith.constant 0 : i32
    return %arg0, %c0_i32 : i32, i32
  }
}

</mosaic_0001>

<bundles_post_ra>
// kernel: tpu_custom_call.1
= control target key start
LH: loop header
LB: loop body
LE: loop exit
PB: predicated region body
PF: predicated region fallthrough
CT: control target
= control target key end

     0   :  { %8 = vsyncpa [#allocation4], 0  ;;  %s726_s0 = inlined_call_operand.hbm [shape: bf16[128,128], index: 0, kind: input, shape index: {}]   ;;  %s727_s1 = inlined_call_operand.hbm [shape: bf16[128,128], index: 1, kind: input, shape index: {}]   ;;  %s728_s2 = inlined_call_operand.hbm [shape: f32[128,128], index: 2, kind: input, shape index: {}]   ;;  %s729_s3 = inlined_call_operand.hbm [shape: f32[128,128], index: 3, kind: output, shape index: {}]  }
   0x1   :  { %9 = vsyncpa [#allocation7], 0 }
   0x2   :  { %10 = vsyncpa [#allocation5], 0  ;;  %s28_s14 = sshll.u32 %s727_s1, 4  ;;  %s680_s15 = smov [#allocation6]   ;;  %s29_s14 = int_to_ptr.hbm [resolvable:$true] %s28_s14 }
   0x3   :  { %s30_s16 = sshll.u32 %s680_s15, 4  ;;  %s15_s19 = sshll.u32 %s726_s0, 4  ;;  %s31_s16 = int_to_ptr.vmem [resolvable:$true] %s30_s16  ;;  %s16_s19 = int_to_ptr.hbm [resolvable:$true] %s15_s19 }
   0x4   :  { %s681_s20 = smov 64   ;;  %s682_s21 = smov 4  }
   0x5   :  { %36 = dma.hbm_to_vmem [thread:$0]  %s29_s14, 1024, %s31_s16, [#allocation7], %s681_s20, %s681_s20, %s682_s21  }
   0x6   :  { %s683_s22 = smov [#allocation3]   ;;  %s41_s26 = sshll.u32 %s728_s2, 4  ;;  %s42_s26 = int_to_ptr.hbm [resolvable:$true] %s41_s26 }
   0x7   :  { %s17_s23 = sshll.u32 %s683_s22, 4  ;;  %s684_s1 = smov [#allocation8]   ;;  %s18_s23 = int_to_ptr.vmem [resolvable:$true] %s17_s23 }
   0x8   :  { %23 = dma.hbm_to_vmem [thread:$0]  %s16_s19, 1024, %s18_s23, [#allocation4], %s681_s20, %s681_s20, %s682_s21  }
   0x9   :  { %s43_s27 = sshll.u32 %s684_s1, 4  ;;  %s685_s28 = smov 128   ;;  %s44_s27 = int_to_ptr.vmem [resolvable:$true] %s43_s27 }
   0xa   :  { %s686_s29 = smov 8  }
   0xb   :  { %49 = dma.hbm_to_vmem [thread:$0]  %s42_s26, 2048, %s44_s27, [#allocation7], %s685_s28, %s685_s28, %s686_s29  }
   0xc   :  { %674 = dma.done.wait [#allocation4], 1024  }
   0xd   :  { %675 = vsyncadd [#allocation4], 4294966272 }
   0xe   :  { %676 = dma.done.wait [#allocation7], 3072  }
   0xf   :  { %677 = vsyncadd [#allocation7], 4294964224  ;;  %v537_v0 = vld [vmem:[#allocation6 + $0x38] sm:$0xff]  ;;  %v536_v1 = vld [vmem:[#allocation6 + $0x30] sm:$0xff]  ;;  %s687_s0 = smov [#allocation9]   ;;  %s450_s5 = sshll.u32 %s729_s3, 4  ;;  %s451_s5 = int_to_ptr.hbm [resolvable:$true] %s450_s5 }
  0x10   :  { %546 = vmatpush.bf16.msra.mxu2 %v537_v0  ;;  %231 = vmatpush.bf16.msra.mxu0 %v537_v0  ;;  %v535_v2 = vld [vmem:[#allocation6 + $0x28] sm:$0xff]  ;;  %v534_v3 = vld [vmem:[#allocation6 + $0x20] sm:$0xff]  ;;  %v533_v4 = vld [vmem:[#allocation6 + $0x18] sm:$0xff]  ;;  %s448_s2 = sshll.u32 %s687_s0, 4  ;;  %s449_s2 = int_to_ptr.vmem [resolvable:$true] %s448_s2 }
  0x11   :  { %v532_v5 = vld [vmem:[#allocation6 + $0x10] sm:$0xff]  ;;  %v531_v6 = vld [vmem:[#allocation6 + $0x8] sm:$0xff]  ;;  %v530_v7 = vld [vmem:[#allocation6] sm:$0xff] }
  0x12   :  { %v542_v8 = vld [vmem:[#allocation3 + $0x20] sm:$0xff]  ;;  %v543_v10 = vld [vmem:[#allocation3 + $0x28] sm:$0xff]  ;;  %v346_v12 = vld [vmem:[#allocation8 + $0x78] sm:$0xff] }
  0x13   :  { %v538_v9 = vld [vmem:[#allocation3] sm:$0xff]  ;;  %v539_v11 = vld [vmem:[#allocation3 + $0x8] sm:$0xff]  ;;  %v345_v13 = vld [vmem:[#allocation8 + $0x70] sm:$0xff]  ;;  %347 = vmatpush.msra.mxu1 %v346_v12  ;;  %554 = vmatpush.msra.mxu3 %v346_v12 }
  0x14   :  { %547 = vmatpush.bf16.msra.mxu2 %v536_v1  ;;  %232 = vmatpush.bf16.msra.mxu0 %v536_v1  ;;  %v344_v14 = vld [vmem:[#allocation8 + $0x68] sm:$0xff]  ;;  %v343_v15 = vld [vmem:[#allocation8 + $0x60] sm:$0xff]  ;;  %v342_v16 = vld [vmem:[#allocation8 + $0x58] sm:$0xff] }
  0x15   :  { %348 = vmatpush.msra.mxu1 %v345_v13  ;;  %555 = vmatpush.msra.mxu3 %v345_v13  ;;  %v341_v17 = vld [vmem:[#allocation8 + $0x50] sm:$0xff]  ;;  %v340_v18 = vld [vmem:[#allocation8 + $0x48] sm:$0xff]  ;;  %v339_v21 = vld [vmem:[#allocation8 + $0x40] sm:$0xff] }
  0x16   :  { %v544_v19 = vld [vmem:[#allocation3 + $0x30] sm:$0xff]  ;;  %v338_v22 = vld [vmem:[#allocation8 + $0x38] sm:$0xff]  ;;  %v336_v24 = vld [vmem:[#allocation8 + $0x28] sm:$0xff] }
  0x17   :  { %349 = vmatpush.msra.mxu1 %v344_v14  ;;  %556 = vmatpush.msra.mxu3 %v344_v14  ;;  %v540_v20 = vld [vmem:[#allocation3 + $0x10] sm:$0xff]  ;;  %v335_v25 = vld [vmem:[#allocation8 + $0x20] sm:$0xff]  ;;  %v334_v26 = vld [vmem:[#allocation8 + $0x18] sm:$0xff] }
  0x18   :  { %548 = vmatpush.bf16.msra.mxu2 %v535_v2  ;;  %233 = vmatpush.bf16.msra.mxu0 %v535_v2  ;;  %v337_v23 = vld [vmem:[#allocation8 + $0x30] sm:$0xff]  ;;  %v332_v28 = vld [vmem:[#allocation8 + $0x8] sm:$0xff]  ;;  %v545_v29 = vld [vmem:[#allocation3 + $0x38] sm:$0xff] }
  0x19   :  { %350 = vmatpush.msra.mxu1 %v343_v15  ;;  %557 = vmatpush.msra.mxu3 %v343_v15  ;;  %v333_v27 = vld [vmem:[#allocation8 + $0x10] sm:$0xff]  ;;  %v541_v30 = vld [vmem:[#allocation3 + $0x18] sm:$0xff]  ;;  %v331_v31 = vld [vmem:[#allocation8] sm:$0xff] }
  0x1b   :  { %351 = vmatpush.msra.mxu1 %v342_v16  ;;  %558 = vmatpush.msra.mxu3 %v342_v16 }
  0x1c   :  { %549 = vmatpush.bf16.msra.mxu2 %v534_v3  ;;  %234 = vmatpush.bf16.msra.mxu0 %v534_v3 }
  0x1d   :  { %352 = vmatpush.msra.mxu1 %v341_v17  ;;  %559 = vmatpush.msra.mxu3 %v341_v17 }
  0x1f   :  { %353 = vmatpush.msra.mxu1 %v340_v18  ;;  %560 = vmatpush.msra.mxu3 %v340_v18 }
  0x20   :  { %550 = vmatpush.bf16.msra.mxu2 %v533_v4  ;;  %235 = vmatpush.bf16.msra.mxu0 %v533_v4 }
  0x21   :  { %354 = vmatpush.msra.mxu1 %v339_v21  ;;  %561 = vmatpush.msra.mxu3 %v339_v21 }
  0x23   :  { %355 = vmatpush.msra.mxu1 %v338_v22  ;;  %562 = vmatpush.msra.mxu3 %v338_v22 }
  0x24   :  { %551 = vmatpush.bf16.msra.mxu2 %v532_v5  ;;  %236 = vmatpush.bf16.msra.mxu0 %v532_v5 }
  0x25   :  { %356 = vmatpush.msra.mxu1 %v337_v23  ;;  %563 = vmatpush.msra.mxu3 %v337_v23 }
  0x27   :  { %357 = vmatpush.msra.mxu1 %v336_v24  ;;  %564 = vmatpush.msra.mxu3 %v336_v24 }
  0x28   :  { %552 = vmatpush.bf16.msra.mxu2 %v531_v6  ;;  %237 = vmatpush.bf16.msra.mxu0 %v531_v6 }
  0x29   :  { %358 = vmatpush.msra.mxu1 %v335_v25  ;;  %565 = vmatpush.msra.mxu3 %v335_v25 }
  0x2b   :  { %359 = vmatpush.msra.mxu1 %v334_v26  ;;  %566 = vmatpush.msra.mxu3 %v334_v26 }
  0x2c   :  { %553 = vmatpush.bf16.msra.mxu2 %v530_v7  ;;  %238 = vmatpush.bf16.msra.mxu0 %v530_v7 }
  0x2d   :  { %360 = vmatpush.msra.mxu1 %v333_v27  ;;  %567 = vmatpush.msra.mxu3 %v333_v27 }
  0x2f   :  { %259 = vmatmul.bf16.vlgmr.msra.gmra.mxu2 %v542_v8  ;;  %239 = vmatmul.bf16.vlgmr.msra.gmra.mxu0 %v538_v9 }
  0x30   :  { %361 = vmatpush.msra.mxu1 %v332_v28  ;;  %568 = vmatpush.msra.mxu3 %v332_v28 }
  0x32   :  { %362 = vmatpush.msra.mxu1 %v331_v31  ;;  %569 = vmatpush.msra.mxu3 %v331_v31 }
  0x3f   :  { %264 = vmatmul.bf16.gmra.mxu2 %v543_v10  ;;  %244 = vmatmul.bf16.gmra.mxu0 %v539_v11 }
  0x4f   :  { %269 = vmatmul.bf16.gmra.mxu2 %v544_v19  ;;  %249 = vmatmul.bf16.gmra.mxu0 %v540_v20 }
  0x5f   :  { %274 = vmatmul.bf16.gmra.mxu2 %v545_v29  ;;  %254 = vmatmul.bf16.gmra.mxu0 %v541_v30 }
  0xac   :  { %v240_v32 = vpop.f32.mrf.mxu0 }
  0xad   :  { %363 = vmatmul.f32.vlgmr.msra.gmra.mxu1 %v240_v32 }
  0xb2   :  { %v260_v33 = vpop.f32.mrf.mxu2 }
  0xb3   :  { %387 = vmatmul.f32.vlgmr.msra.gmra.mxu3 %v260_v33 }
  0xb4   :  { %v242_v34 = vpop.f32.mrf.mxu0 }
  0xb5   :  { %366 = vmatmul.f32.gmra.mxu1 %v242_v34 }
  0xba   :  { %v262_v35 = vpop.f32.mrf.mxu2 }
  0xbb   :  { %390 = vmatmul.f32.gmra.mxu3 %v262_v35 }
  0xbc   :  { %v245_v36 = vpop.f32.mrf.mxu0 }
  0xbd   :  { %369 = vmatmul.f32.gmra.mxu1 %v245_v36 }
  0xc2   :  { %v265_v37 = vpop.f32.mrf.mxu2 }
  0xc3   :  { %393 = vmatmul.f32.gmra.mxu3 %v265_v37 }
  0xc4   :  { %v247_v38 = vpop.f32.mrf.mxu0 }
  0xc5   :  { %372 = vmatmul.f32.gmra.mxu1 %v247_v38 }
  0xca   :  { %v267_v39 = vpop.f32.mrf.mxu2 }
  0xcb   :  { %396 = vmatmul.f32.gmra.mxu3 %v267_v39 }
  0xcc   :  { %v250_v40 = vpop.f32.mrf.mxu0 }
  0xcd   :  { %375 = vmatmul.f32.gmra.mxu1 %v250_v40 }
  0xd2   :  { %v270_v41 = vpop.f32.mrf.mxu2 }
  0xd3   :  { %399 = vmatmul.f32.gmra.mxu3 %v270_v41 }
  0xd4   :  { %v252_v42 = vpop.f32.mrf.mxu0 }
  0xd5   :  { %378 = vmatmul.f32.gmra.mxu1 %v252_v42 }
  0xda   :  { %v272_v43 = vpop.f32.mrf.mxu2 }
  0xdb   :  { %402 = vmatmul.f32.gmra.mxu3 %v272_v43 }
  0xdc   :  { %v255_v44 = vpop.f32.mrf.mxu0 }
  0xdd   :  { %381 = vmatmul.f32.gmra.mxu1 %v255_v44 }
  0xe2   :  { %v275_v45 = vpop.f32.mrf.mxu2 }
  0xe3   :  { %405 = vmatmul.f32.gmra.mxu3 %v275_v45 }
  0xe4   :  { %v257_v46 = vpop.f32.mrf.mxu0 }
  0xe5   :  { %384 = vmatmul.f32.gmra.mxu1 %v257_v46 }
  0xea   :  { %v277_v47 = vpop.f32.mrf.mxu2 }
  0xeb   :  { %408 = vmatmul.f32.gmra.mxu3 %v277_v47 }
 0x12a   :  { %v364_v48 = vpop.f32.mrf.mxu1 }
 0x12b   :  { %v412_v49 = vmax.f32 %v364_v48, 0.0 }
 0x12d   :  { %428 = vst [vmem:[#allocation9] sm:$0xff] %v412_v49 }
 0x132   :  { %v367_v50 = vpop.f32.mrf.mxu1 }
 0x133   :  { %v413_v51 = vmax.f32 %v367_v50, 0.0 }
 0x135   :  { %429 = vst [vmem:[#allocation9 + $0x8] sm:$0xff] %v413_v51 }
 0x136   :  { %v388_v52 = vpop.f32.mrf.mxu3 }
 0x137   :  { %v420_v53 = vmax.f32 %v388_v52, 0.0 }
 0x139   :  { %436 = vst [vmem:[#allocation9 + $0x40] sm:$0xff] %v420_v53 }
 0x13a   :  { %v370_v54 = vpop.f32.mrf.mxu1 }
 0x13b   :  { %v414_v55 = vmax.f32 %v370_v54, 0.0 }
 0x13d   :  { %430 = vst [vmem:[#allocation9 + $0x10] sm:$0xff] %v414_v55 }
 0x13e   :  { %v391_v56 = vpop.f32.mrf.mxu3 }
 0x13f   :  { %v421_v57 = vmax.f32 %v391_v56, 0.0 }
 0x141   :  { %437 = vst [vmem:[#allocation9 + $0x48] sm:$0xff] %v421_v57 }
 0x142   :  { %v373_v58 = vpop.f32.mrf.mxu1 }
 0x143   :  { %v415_v59 = vmax.f32 %v373_v58, 0.0 }
 0x145   :  { %431 = vst [vmem:[#allocation9 + $0x18] sm:$0xff] %v415_v59 }
 0x146   :  { %v394_v60 = vpop.f32.mrf.mxu3 }
 0x147   :  { %v422_v61 = vmax.f32 %v394_v60, 0.0 }
 0x149   :  { %438 = vst [vmem:[#allocation9 + $0x50] sm:$0xff] %v422_v61 }
 0x14a   :  { %v376_v62 = vpop.f32.mrf.mxu1 }
 0x14b   :  { %v416_v63 = vmax.f32 %v376_v62, 0.0 }
 0x14d   :  { %432 = vst [vmem:[#allocation9 + $0x20] sm:$0xff] %v416_v63 }
 0x14e   :  { %v397_v0 = vpop.f32.mrf.mxu3 }
 0x14f   :  { %v423_v1 = vmax.f32 %v397_v0, 0.0 }
 0x151   :  { %439 = vst [vmem:[#allocation9 + $0x58] sm:$0xff] %v423_v1 }
 0x152   :  { %v379_v2 = vpop.f32.mrf.mxu1 }
 0x153   :  { %v417_v3 = vmax.f32 %v379_v2, 0.0 }
 0x155   :  { %433 = vst [vmem:[#allocation9 + $0x28] sm:$0xff] %v417_v3 }
 0x156   :  { %v400_v4 = vpop.f32.mrf.mxu3 }
 0x157   :  { %v424_v5 = vmax.f32 %v400_v4, 0.0 }
 0x159   :  { %440 = vst [vmem:[#allocation9 + $0x60] sm:$0xff] %v424_v5 }
 0x15a   :  { %v382_v6 = vpop.f32.mrf.mxu1 }
 0x15b   :  { %v418_v7 = vmax.f32 %v382_v6, 0.0 }
 0x15d   :  { %434 = vst [vmem:[#allocation9 + $0x30] sm:$0xff] %v418_v7 }
 0x15e   :  { %v403_v8 = vpop.f32.mrf.mxu3 }
 0x15f   :  { %v425_v9 = vmax.f32 %v403_v8, 0.0 }
 0x161   :  { %441 = vst [vmem:[#allocation9 + $0x68] sm:$0xff] %v425_v9 }
 0x162   :  { %v385_v10 = vpop.f32.mrf.mxu1 }
 0x163   :  { %v419_v11 = vmax.f32 %v385_v10, 0.0 }
 0x165   :  { %435 = vst [vmem:[#allocation9 + $0x38] sm:$0xff] %v419_v11 }
 0x166   :  { %v406_v12 = vpop.f32.mrf.mxu3 }
 0x167   :  { %v426_v13 = vmax.f32 %v406_v12, 0.0 }
 0x169   :  { %442 = vst [vmem:[#allocation9 + $0x70] sm:$0xff] %v426_v13 }
 0x16e   :  { %v409_v14 = vpop.f32.mrf.mxu3 }
 0x16f   :  { %v427_v15 = vmax.f32 %v409_v14, 0.0 }
 0x171   :  { %443 = vst [vmem:[#allocation9 + $0x78] sm:$0xff] %v427_v15 }
 0x172   :  { %456 = dma.vmem_to_hbm [thread:$0]  %s449_s2, 2048, %s451_s5, [#allocation5], %s685_s28, %s685_s28, %s686_s29  }
 0x173   :  { %678 = dma.done.wait [#allocation5], 2048  }
 0x174   :  { %679 = vsyncadd [#allocation5], 4294965248 }
 0x175   :  { %461 = vsyncpa [#allocation4], 1 }
 0x176   :  { %462 = vsyncpa [#allocation7], 1 }
 0x177   :  { %463 = vsyncpa [#allocation5], 1 }

</bundles_post_ra>
